<compile_context>
chip_gen: v7x
topology: tpu7x:2x2x1
jax: 0.10.0
libtpu: 0.0.40
codegen_flags: <defaults>
</compile_context>

<pallas_src>
import functools

import jax
import jax.numpy as jnp
from jax.experimental import pallas as pl
from jax.experimental.pallas import tpu as pltpu

BN_EPS = 1e-5  # nn.BatchNorm1d default


def _round_up(v, m):
    return ((v + m - 1) // m) * m


def _vmem_budget_bytes():
    """~70% of physical VMEM; conservative 64 MiB (v7x per-TC) if the query is unavailable."""
    cap = 64 << 20
    try:
        cap = int(pltpu.get_tpu_info().vmem_capacity_bytes)
    except Exception:
        pass
    return max(int(0.70 * cap), 16 << 20)


def _pick_tile_b(batch, max_tile_b=None):
    """Largest power-of-two batch tile (>=128) that divides the batch; else one tile."""
    for cand in (1024, 512, 256, 128):
        if max_tile_b is not None and cand > max_tile_b:
            continue
        if batch >= cand and batch % cand == 0:
            return cand
    return batch


def _pad_col(v, k, kp):
    col = v.reshape(k, 1).astype(jnp.float32)
    return jnp.pad(col, ((0, kp - k), (0, 0))) if kp > k else col


def _prep_weight(w, k_in, k_out, kp_in, kp_out, use_bf16):
    """PyTorch-layout weight (out, in) -> kernel operand, padded to (kp_out, kp_in)."""
    w = w.astype(jnp.float32)
    if kp_in == 1:                        # outer-product path (VPU): column (out, 1)
        return _pad_col(w.reshape(k_out, 1), k_out, kp_out)
    if kp_out == 1:                       # reduction path (VPU/XLU): column (in, 1)
        return _pad_col(w.reshape(k_in, 1), k_in, kp_in)
    wp = jnp.pad(w, ((0, kp_out - k_out), (0, kp_in - k_in)))
    return wp.astype(jnp.bfloat16) if use_bf16 else wp   # MXU path


def _prep_operands(x, params, dims, dims_pad, use_bf16):
    """[x^T (d_in,B)] + per hidden layer [W, b, gamma, beta] + [W_last, b_last], padded."""
    n_hidden = len(dims) - 2
    args = [x.astype(jnp.float32).T]                      # batch on the lane axis
    idx = 0
    for layer in range(n_hidden):
        k_in, k_out = dims[layer], dims[layer + 1]
        kp_in, kp_out = dims_pad[layer], dims_pad[layer + 1]
        w, b, gamma, beta = params[idx:idx + 4]
        idx += 4
        args += [_prep_weight(w, k_in, k_out, kp_in, kp_out, use_bf16),
                 _pad_col(b, k_out, kp_out),
                 _pad_col(gamma, k_out, kp_out),
                 _pad_col(beta, k_out, kp_out)]
    w_last, b_last = params[idx], params[idx + 1]
    k_in, k_out = dims[-2], dims[-1]
    kp_in, kp_out = dims_pad[-2], dims_pad[-1]
    args += [_prep_weight(w_last, k_in, k_out, kp_in, kp_out, use_bf16),
             _pad_col(b_last, k_out, kp_out)]
    return args


def _linear(w_ref, b_ref, a, k_in, k_out):
    """W @ a + b in feature-major layout; a is (k_in, B) f32."""
    b = b_ref[...]
    if k_in == 1:                                         # outer product on the VPU
        return w_ref[...] * a + b
    if k_out == 1:                                        # per-feature weighted reduction
        return jnp.sum(w_ref[...] * a, axis=0, keepdims=True) + b
    w = w_ref[...]
    if w.dtype == jnp.bfloat16:                           # bf16 operands, f32 accumulation
        a = a.astype(jnp.bfloat16)
    return jnp.dot(w, a, preferred_element_type=jnp.float32) + b


# ---------------------------------------------------------------------------
# Fast path: the whole network in a single grid step (exact, centered BN stats).
# ---------------------------------------------------------------------------
def _make_fast_kernel(dims_pad, batch):
    n_hidden = len(dims_pad) - 2
    hidden = dims_pad[1:-1]
    d_in, d_out = dims_pad[0], dims_pad[-1]
    inv_b = 1.0 / float(batch)

    def kernel(*refs):
        x_ref = refs[0]
        params = refs[1:-1]
        o_ref = refs[-1]

        a = x_ref[...]
        k_in = d_in
        for layer in range(n_hidden):
            k_out = hidden[layer]
            w_ref, b_ref, g_ref, be_ref = params[4 * layer:4 * layer + 4]
            h = _linear(w_ref, b_ref, a, k_in, k_out)          # (k_out, B) f32
            mean = jnp.sum(h, axis=1, keepdims=True) * inv_b
            c = h - mean
            var = jnp.sum(c * c, axis=1, keepdims=True) * inv_b
            scale = g_ref[...] * jax.lax.rsqrt(var + BN_EPS)
            a = jnp.maximum(c * scale + be_ref[...], 0.0)
            k_in = k_out
        o_ref[...] = _linear(params[-2], params[-1], a, k_in, d_out)

    return kernel


# ---------------------------------------------------------------------------
# Multi-pass fallback: batch-tiled grid with exact cross-tile BN statistics.
# ---------------------------------------------------------------------------
def _make_multipass_kernel(dims_pad, batch, tile_b, stash_dtype):
    n_hidden = len(dims_pad) - 2
    hidden = dims_pad[1:-1]
    d_in, d_out = dims_pad[0], dims_pad[-1]
    n_params = 4 * n_hidden + 2
    inv_b = 1.0 / float(batch)
    tb_f = float(tile_b)

    def kernel(*refs):
        x_ref = refs[0]
        params = refs[1:1 + n_params]
        o_ref = refs[1 + n_params]
        h_raw, mean_acc, m2_acc, bn_scale, bn_shift = refs[2 + n_params:]

        p = pl.program_id(0)   # pass (layer) index
        t = pl.program_id(1)   # batch-tile index

        def reset_stats():
            mean_acc[...] = jnp.zeros_like(mean_acc)
            m2_acc[...] = jnp.zeros_like(m2_acc)

        def accumulate_stats(h_val, width):
            # Chan/Welford parallel combine of per-tile moments -> exact batch variance.
            n_old = t.astype(jnp.float32) * tb_f
            n_new = n_old + tb_f
            tile_mean = jnp.sum(h_val, axis=1, keepdims=True) * (1.0 / tb_f)
            c = h_val - tile_mean
            tile_m2 = jnp.sum(c * c, axis=1, keepdims=True)
            delta = tile_mean - mean_acc[:width, :]
            mean_acc[:width, :] += delta * (tb_f / n_new)
            m2_acc[:width, :] += tile_m2 + delta * delta * (n_old * tb_f / n_new)

        def finalize_stats(layer):
            width = hidden[layer]
            gamma = params[4 * layer + 2][...]
            beta = params[4 * layer + 3][...]
            mean = mean_acc[:width, :]
            var = m2_acc[:width, :] * inv_b                   # biased, as in training BN
            scale = gamma * jax.lax.rsqrt(var + BN_EPS)
            bn_scale[:width, :] = scale
            bn_shift[:width, :] = beta - mean * scale

        def bn_relu(layer):
            width = hidden[layer]
            a = h_raw[t, :width, :].astype(jnp.float32)
            return jnp.maximum(a * bn_scale[:width, :] + bn_shift[:width, :], 0.0)

        if n_hidden >= 1:
            # ---- pass 0: first hidden Linear + tile-stat accumulation ----
            @pl.when(p == 0)
            def _():
                @pl.when(t == 0)
                def _():
                    reset_stats()
                h0 = hidden[0]
                hv = _linear(params[0], params[1], x_ref[...], d_in, h0)
                accumulate_stats(hv, h0)
                h_raw[t, :h0, :] = hv.astype(stash_dtype)

            # ---- passes 1..n_hidden-1: BN+ReLU of previous layer, next Linear + stats ----
            for layer in range(1, n_hidden):
                k_in, k_out = hidden[layer - 1], hidden[layer]
                w_ref, b_ref = params[4 * layer], params[4 * layer + 1]

                @pl.when(p == layer)
                def _(layer=layer, k_in=k_in, k_out=k_out, w_ref=w_ref, b_ref=b_ref):
                    @pl.when(t == 0)
                    def _():
                        finalize_stats(layer - 1)
                        reset_stats()
                    xin = bn_relu(layer - 1)
                    hv = _linear(w_ref, b_ref, xin, k_in, k_out)
                    accumulate_stats(hv, k_out)
                    h_raw[t, :k_out, :] = hv.astype(stash_dtype)

        # ---- final pass: BN+ReLU of last hidden layer, then last Linear ----
        @pl.when(p == n_hidden)
        def _():
            if n_hidden == 0:
                xin, k_last = x_ref[...], d_in
            else:
                @pl.when(t == 0)
                def _():
                    finalize_stats(n_hidden - 1)
                xin, k_last = bn_relu(n_hidden - 1), hidden[-1]
            o_ref[...] = _linear(params[-2], params[-1], xin, k_last, d_out)

    return kernel


@functools.partial(jax.jit,
                   static_argnames=("n_nodes_list", "use_bf16", "force_multipass", "max_tile_b"))
def network_forward(x, params, *, n_nodes_list, use_bf16=True,
                    force_multipass=False, max_tile_b=None):
    """Forward pass of `Network` (training-mode BatchNorm1d, batch statistics)."""
    dims = tuple(int(d) for d in n_nodes_list)
    n_hidden = len(dims) - 2
    d_in, d_out = dims[0], dims[-1]
    pad_mult = 16 if use_bf16 else 8                      # sublane multiple for the stash dtype
    dims_pad = (d_in,) + tuple(_round_up(h, pad_mult) for h in dims[1:-1]) + (d_out,)
    h_pad_max = max(dims_pad[1:-1]) if n_hidden else 1

    batch = x.shape[0]
    args = _prep_operands(x, params, dims, dims_pad, use_bf16)

    budget = _vmem_budget_bytes()
    resident = sum(a.size * a.dtype.itemsize for a in args[1:])
    est_fast = resident + (d_in + d_out + 4 * h_pad_max) * batch * 4
    use_fast = (not force_multipass) and est_fast <= int(0.35 * budget)

    if use_fast:
        # ---- single-invocation fast path ----
        vmem_limit = int(min(max(3 * est_fast, 16 << 20), budget))
        grid_spec = pltpu.PrefetchScalarGridSpec(
            num_scalar_prefetch=0,
            grid=(1,),
            in_specs=[pl.BlockSpec(a.shape, lambda i: (0, 0)) for a in args],
            out_specs=pl.BlockSpec((d_out, batch), lambda i: (0, 0)),
        )
        yt = pl.pallas_call(
            _make_fast_kernel(dims_pad, batch),
            grid_spec=grid_spec,
            out_shape=jax.ShapeDtypeStruct((d_out, batch), jnp.float32),
            compiler_params=pltpu.CompilerParams(
                dimension_semantics=("arbitrary",),
                vmem_limit_bytes=vmem_limit,
            ),
        )(*args)
        return yt.T

    # ---- multi-pass fallback (large batches) ----
    tile_b = _pick_tile_b(batch, max_tile_b)
    n_tiles = batch // tile_b
    stash_dtype = jnp.bfloat16 if use_bf16 else jnp.float32
    stash_item = 2 if use_bf16 else 4
    n_h = n_hidden

    # x is only read at pass 0; the output only written at the final pass.  Freezing the block
    # index for the other passes avoids redundant HBM re-fetches / stale writebacks.
    in_specs = [pl.BlockSpec((d_in, tile_b), lambda p, t: (0, jnp.where(p == 0, t, 0)))]
    in_specs += [pl.BlockSpec(a.shape, lambda p, t: (0, 0)) for a in args[1:]]
    out_specs = pl.BlockSpec((d_out, tile_b), lambda p, t: (0, jnp.where(p == n_h, t, 0)))

    scratch_shapes = [
        pltpu.VMEM((n_tiles, h_pad_max, tile_b), stash_dtype),   # raw pre-BN activations
        pltpu.VMEM((h_pad_max, 1), jnp.float32),                 # running mean
        pltpu.VMEM((h_pad_max, 1), jnp.float32),                 # running M2 (sum sq dev)
        pltpu.VMEM((h_pad_max, 1), jnp.float32),                 # BN scale
        pltpu.VMEM((h_pad_max, 1), jnp.float32),                 # BN shift
    ]

    stash_bytes = n_tiles * h_pad_max * tile_b * stash_item
    streamed = 2 * (d_in + d_out) * tile_b * 4               # double-buffered x / out tiles
    need = 2 * resident + 2 * streamed + stash_bytes + 16 * h_pad_max + (4 << 20)
    if need > budget:
        # TODO(synk): stage h_raw in HBM (pl.ANY + manual make_async_copy double-buffering).
        raise NotImplementedError(
            f"activation stash ({stash_bytes / 2**20:.1f} MiB) exceeds the VMEM budget "
            f"({budget / 2**20:.1f} MiB); HBM staging not implemented yet.")
    vmem_limit = int(min(max(need, 16 << 20), budget))

    grid_spec = pltpu.PrefetchScalarGridSpec(
        num_scalar_prefetch=0,
        grid=(n_hidden + 1, n_tiles),
        in_specs=in_specs,
        out_specs=out_specs,
        scratch_shapes=scratch_shapes,
    )
    yt = pl.pallas_call(
        _make_multipass_kernel(dims_pad, batch, tile_b, stash_dtype),
        grid_spec=grid_spec,
        out_shape=jax.ShapeDtypeStruct((d_out, batch), jnp.float32),
        compiler_params=pltpu.CompilerParams(
            # Both axes carry a sequential dependency (global BN stats), so keep them "arbitrary".
            dimension_semantics=("arbitrary", "arbitrary"),
            vmem_limit_bytes=vmem_limit,
        ),
    )(*args)
    return yt.T


def init_params(key, n_nodes_list):
    """PyTorch-shaped params: per hidden layer (W (out,in), b (out,), gamma (out,), beta (out,)),
    then (W_last (out,in), b_last (out,))."""
    dims = tuple(n_nodes_list)
    params = []
    for k_in, k_out in zip(dims[:-2], dims[1:-1]):
        key, kw, kb, kg, kbe = jax.random.split(key, 5)
        bound = float(k_in) ** -0.5
        params += [
            jax.random.uniform(kw, (k_out, k_in), jnp.float32, -bound, bound),
            jax.random.uniform(kb, (k_out,), jnp.float32, -bound, bound),
            1.0 + 0.1 * jax.random.normal(kg, (k_out,), jnp.float32),
            0.1 * jax.random.normal(kbe, (k_out,), jnp.float32),
        ]
    k_in, k_out = dims[-2], dims[-1]
    key, kw, kb = jax.random.split(key, 3)
    bound = float(k_in) ** -0.5
    params += [
        jax.random.uniform(kw, (k_out, k_in), jnp.float32, -bound, bound),
        jax.random.uniform(kb, (k_out,), jnp.float32, -bound, bound),
    ]
    return params


def network_forward_ref(x, params, n_nodes_list):
    """Pure-JAX f32 reference, faithful to the PyTorch module (training-mode BatchNorm1d)."""
    dims = tuple(n_nodes_list)
    n_hidden = len(dims) - 2
    h = x.astype(jnp.float32)
    idx = 0
    for _ in range(n_hidden):
        w, b, gamma, beta = params[idx:idx + 4]
        idx += 4
        h = h @ w.T + b
        mean = jnp.mean(h, axis=0, keepdims=True)
        var = jnp.mean(jnp.square(h - mean), axis=0, keepdims=True)   # biased var (training BN)
        h = (h - mean) / jnp.sqrt(var + BN_EPS) * gamma + beta
        h = jnp.maximum(h, 0.0)
    w, b = params[idx], params[idx + 1]
    return h @ w.T + b


if __name__ == "__main__":
    key = jax.random.PRNGKey(0)

    # --- Config 1: module default [1, 32, 1] (K==1 / N==1 VPU paths), single-step fast path ---
    n_nodes1 = (1, 32, 1)
    batch1 = 512
    key, kx1, kp1 = jax.random.split(key, 3)
    x1 = jax.random.normal(kx1, (batch1, n_nodes1[0]), jnp.float32)
    params1 = init_params(kp1, n_nodes1)
    y1 = jax.block_until_ready(network_forward(x1, params1, n_nodes_list=n_nodes1))
    y1_ref = network_forward_ref(x1, params1, n_nodes1)
    assert y1.shape == (batch1, n_nodes1[-1])
    assert jnp.allclose(y1, y1_ref, atol=5e-3, rtol=5e-3), "config1 mismatch vs reference"

    # --- Config 2: two hidden layers wide enough to exercise the MXU, fast path ---
    n_nodes2 = (8, 64, 32, 1)
    batch2 = 256
    key, kx2, kp2 = jax.random.split(key, 3)
    x2 = jax.random.normal(kx2, (batch2, n_nodes2[0]), jnp.float32)
    params2 = init_params(kp2, n_nodes2)
    y2_ref = network_forward_ref(x2, params2, n_nodes2)

    y2_f32 = jax.block_until_ready(
        network_forward(x2, params2, n_nodes_list=n_nodes2, use_bf16=False))
    assert y2_f32.shape == (batch2, n_nodes2[-1])
    assert jnp.allclose(y2_f32, y2_ref, atol=5e-3, rtol=5e-3), "config2 f32 mismatch"

    y2_bf16 = jax.block_until_ready(
        network_forward(x2, params2, n_nodes_list=n_nodes2, use_bf16=True))
    assert jnp.allclose(y2_bf16, y2_ref, atol=1e-1, rtol=1e-1), "config2 bf16 mismatch"

    # --- Config 3: force the multi-pass fallback (4 batch tiles) to exercise the cross-tile
    #     Welford stat combine, frozen x/out index maps and the (bf16) activation stash ---
    n_nodes3 = (8, 64, 32, 1)
    batch3 = 512
    key, kx3, kp3 = jax.random.split(key, 3)
    x3 = jax.random.normal(kx3, (batch3, n_nodes3[0]), jnp.float32)
    params3 = init_params(kp3, n_nodes3)
    y3_ref = network_forward_ref(x3, params3, n_nodes3)

    y3_f32 = jax.block_until_ready(
        network_forward(x3, params3, n_nodes_list=n_nodes3, use_bf16=False,
                        force_multipass=True, max_tile_b=128))
    assert jnp.allclose(y3_f32, y3_ref, atol=1e-2, rtol=1e-2), "config3 multipass f32 mismatch"

    y3_bf16 = jax.block_until_ready(
        network_forward(x3, params3, n_nodes_list=n_nodes3, use_bf16=True,
                        force_multipass=True, max_tile_b=128))
    assert jnp.allclose(y3_bf16, y3_ref, atol=1e-1, rtol=1e-1), "config3 multipass bf16 mismatch"

    print("KERNEL_OK")
</pallas_src>

<mosaic_0001>
module attributes {stable_mosaic.version = 11 : i64} {
  func.func @kernel(%arg0: i32, %arg1: memref<1x512xf32, #tpu.memory_space<vmem>>, %arg2: memref<32x1xf32, #tpu.memory_space<vmem>>, %arg3: memref<32x1xf32, #tpu.memory_space<vmem>>, %arg4: memref<32x1xf32, #tpu.memory_space<vmem>>, %arg5: memref<32x1xf32, #tpu.memory_space<vmem>>, %arg6: memref<32x1xf32, #tpu.memory_space<vmem>>, %arg7: memref<1x1xf32, #tpu.memory_space<vmem>>, %arg8: memref<1x512xf32, #tpu.memory_space<vmem>>) attributes {dimension_semantics = [#tpu.dimension_semantics<arbitrary>], iteration_bounds = array<i64: 1>, scalar_prefetch = 0 : i64, scratch_operands = 0 : i64, tpu.core_type = #tpu.core_type<tc>, window_params = [{pipeline_mode = #tpu.pipeline_mode<synchronous>, transform_indices = @transform_0, window_bounds = array<i64: 1, 512>}, {pipeline_mode = #tpu.pipeline_mode<synchronous>, transform_indices = @transform_1, window_bounds = array<i64: 32, 1>}, {pipeline_mode = #tpu.pipeline_mode<synchronous>, transform_indices = @transform_2, window_bounds = array<i64: 32, 1>}, {pipeline_mode = #tpu.pipeline_mode<synchronous>, transform_indices = @transform_3, window_bounds = array<i64: 32, 1>}, {pipeline_mode = #tpu.pipeline_mode<synchronous>, transform_indices = @transform_4, window_bounds = array<i64: 32, 1>}, {pipeline_mode = #tpu.pipeline_mode<synchronous>, transform_indices = @transform_5, window_bounds = array<i64: 32, 1>}, {pipeline_mode = #tpu.pipeline_mode<synchronous>, transform_indices = @transform_6, window_bounds = array<i64: 1, 1>}, {pipeline_mode = #tpu.pipeline_mode<synchronous>, transform_indices = @transform_7, window_bounds = array<i64: 1, 512>}]} {
    %c0 = arith.constant 0 : index
    %c0_0 = arith.constant 0 : index
    %0 = vector.load %arg1[%c0, %c0_0] : memref<1x512xf32, #tpu.memory_space<vmem>>, vector<1x512xf32>
    %c0_1 = arith.constant 0 : index
    %c0_2 = arith.constant 0 : index
    %1 = vector.load %arg3[%c0_1, %c0_2] : memref<32x1xf32, #tpu.memory_space<vmem>>, vector<32x1xf32>
    %c0_3 = arith.constant 0 : index
    %c0_4 = arith.constant 0 : index
    %2 = vector.load %arg2[%c0_3, %c0_4] : memref<32x1xf32, #tpu.memory_space<vmem>>, vector<32x1xf32>
    %3 = vector.broadcast %2 : vector<32x1xf32> to vector<32x512xf32>
    %4 = vector.broadcast %0 : vector<1x512xf32> to vector<32x512xf32>
    %5 = arith.mulf %3, %4 : vector<32x512xf32>
    %6 = vector.broadcast %1 : vector<32x1xf32> to vector<32x512xf32>
    %7 = arith.addf %5, %6 : vector<32x512xf32>
    %cst = arith.constant dense<0.000000e+00> : vector<32xf32>
    %8 = vector.multi_reduction <add>, %7, %cst [1] : vector<32x512xf32> to vector<32xf32>
    %9 = vector.shape_cast %8 : vector<32xf32> to vector<32x1xf32>
    %cst_5 = arith.constant 0.001953125 : f32
    %10 = vector.broadcast %cst_5 : f32 to vector<32x1xf32>
    %11 = arith.mulf %9, %10 : vector<32x1xf32>
    %12 = vector.broadcast %11 : vector<32x1xf32> to vector<32x512xf32>
    %13 = arith.subf %7, %12 : vector<32x512xf32>
    %14 = arith.mulf %13, %13 : vector<32x512xf32>
    %cst_6 = arith.constant dense<0.000000e+00> : vector<32xf32>
    %15 = vector.multi_reduction <add>, %14, %cst_6 [1] : vector<32x512xf32> to vector<32xf32>
    %16 = vector.shape_cast %15 : vector<32xf32> to vector<32x1xf32>
    %cst_7 = arith.constant 0.001953125 : f32
    %17 = vector.broadcast %cst_7 : f32 to vector<32x1xf32>
    %18 = arith.mulf %16, %17 : vector<32x1xf32>
    %c0_8 = arith.constant 0 : index
    %c0_9 = arith.constant 0 : index
    %19 = vector.load %arg4[%c0_8, %c0_9] : memref<32x1xf32, #tpu.memory_space<vmem>>, vector<32x1xf32>
    %cst_10 = arith.constant 9.99999974E-6 : f32
    %20 = vector.broadcast %cst_10 : f32 to vector<32x1xf32>
    %21 = arith.addf %18, %20 : vector<32x1xf32>
    %22 = math.rsqrt %21 : vector<32x1xf32>
    %23 = arith.mulf %19, %22 : vector<32x1xf32>
    %24 = vector.broadcast %23 : vector<32x1xf32> to vector<32x512xf32>
    %25 = arith.mulf %13, %24 : vector<32x512xf32>
    %c0_11 = arith.constant 0 : index
    %c0_12 = arith.constant 0 : index
    %26 = vector.load %arg5[%c0_11, %c0_12] : memref<32x1xf32, #tpu.memory_space<vmem>>, vector<32x1xf32>
    %27 = vector.broadcast %26 : vector<32x1xf32> to vector<32x512xf32>
    %28 = arith.addf %25, %27 : vector<32x512xf32>
    %cst_13 = arith.constant 0.000000e+00 : f32
    %29 = vector.broadcast %cst_13 : f32 to vector<32x512xf32>
    %30 = arith.maximumf %28, %29 : vector<32x512xf32>
    %c0_14 = arith.constant 0 : index
    %c0_15 = arith.constant 0 : index
    %31 = vector.load %arg7[%c0_14, %c0_15] : memref<1x1xf32, #tpu.memory_space<vmem>>, vector<1x1xf32>
    %c0_16 = arith.constant 0 : index
    %c0_17 = arith.constant 0 : index
    %32 = vector.load %arg6[%c0_16, %c0_17] : memref<32x1xf32, #tpu.memory_space<vmem>>, vector<32x1xf32>
    %33 = vector.broadcast %32 : vector<32x1xf32> to vector<32x512xf32>
    %34 = arith.mulf %33, %30 : vector<32x512xf32>
    %cst_18 = arith.constant dense<0.000000e+00> : vector<512xf32>
    %35 = vector.multi_reduction <add>, %34, %cst_18 [0] : vector<32x512xf32> to vector<512xf32>
    %36 = vector.shape_cast %35 : vector<512xf32> to vector<1x512xf32>
    %37 = vector.broadcast %31 : vector<1x1xf32> to vector<1x512xf32>
    %38 = arith.addf %36, %37 : vector<1x512xf32>
    %c0_19 = arith.constant 0 : index
    %c0_20 = arith.constant 0 : index
    %39 = vector.load %arg8[%c0_19, %c0_20] : memref<1x512xf32, #tpu.memory_space<vmem>>, vector<1x512xf32>
    tpu.vector_store %arg8[%c0_19, %c0_20], %38 {strides = array<i32>} : memref<1x512xf32, #tpu.memory_space<vmem>>, vector<1x512xf32>,
    return
  }
  func.func @transform_0(%arg0: i32) -> (i32, i32) {
    %c0_i32 = arith.constant 0 : i32
    %c0_i32_0 = arith.constant 0 : i32
    %c0_i32_1 = arith.constant 0 : i32
    return %c0_i32, %c0_i32_0 : i32, i32
  }
  func.func @transform_1(%arg0: i32) -> (i32, i32) {
    %c0_i32 = arith.constant 0 : i32
    %c0_i32_0 = arith.constant 0 : i32
    %c0_i32_1 = arith.constant 0 : i32
    return %c0_i32, %c0_i32_0 : i32, i32
  }
  func.func @transform_2(%arg0: i32) -> (i32, i32) {
    %c0_i32 = arith.constant 0 : i32
    %c0_i32_0 = arith.constant 0 : i32
    %c0_i32_1 = arith.constant 0 : i32
    return %c0_i32, %c0_i32_0 : i32, i32
  }
  func.func @transform_3(%arg0: i32) -> (i32, i32) {
    %c0_i32 = arith.constant 0 : i32
    %c0_i32_0 = arith.constant 0 : i32
    %c0_i32_1 = arith.constant 0 : i32
    return %c0_i32, %c0_i32_0 : i32, i32
  }
  func.func @transform_4(%arg0: i32) -> (i32, i32) {
    %c0_i32 = arith.constant 0 : i32
    %c0_i32_0 = arith.constant 0 : i32
    %c0_i32_1 = arith.constant 0 : i32
    return %c0_i32, %c0_i32_0 : i32, i32
  }
  func.func @transform_5(%arg0: i32) -> (i32, i32) {
    %c0_i32 = arith.constant 0 : i32
    %c0_i32_0 = arith.constant 0 : i32
    %c0_i32_1 = arith.constant 0 : i32
    return %c0_i32, %c0_i32_0 : i32, i32
  }
  func.func @transform_6(%arg0: i32) -> (i32, i32) {
    %c0_i32 = arith.constant 0 : i32
    %c0_i32_0 = arith.constant 0 : i32
    %c0_i32_1 = arith.constant 0 : i32
    return %c0_i32, %c0_i32_0 : i32, i32
  }
  func.func @transform_7(%arg0: i32) -> (i32, i32) {
    %c0_i32 = arith.constant 0 : i32
    %c0_i32_0 = arith.constant 0 : i32
    %c0_i32_1 = arith.constant 0 : i32
    return %c0_i32, %c0_i32_0 : i32, i32
  }
}

</mosaic_0001>

<bundles_post_ra>
// kernel: network_forward.1
= control target key start
LH: loop header
LB: loop body
LE: loop exit
PB: predicated region body
PF: predicated region fallthrough
CT: control target
= control target key end

     0   :  { %s708_s0 = inlined_call_operand.vmem [shape: f32[1,512], index: 0, kind: input, shape index: {}]   ;;  %s709_s1 = inlined_call_operand.vmem [shape: f32[32,1], index: 1, kind: input, shape index: {}]   ;;  %s710_s2 = inlined_call_operand.vmem [shape: f32[32,1], index: 2, kind: input, shape index: {}]   ;;  %s711_s3 = inlined_call_operand.vmem [shape: f32[32,1], index: 3, kind: input, shape index: {}]   ;;  %s712_s4 = inlined_call_operand.vmem [shape: f32[32,1], index: 4, kind: input, shape index: {}]   ;;  %s713_s5 = inlined_call_operand.vmem [shape: f32[32,1], index: 5, kind: input, shape index: {}]   ;;  %s714_s6 = inlined_call_operand.<no memory space> [shape: f32[1,1], index: 6, kind: input, shape index: {}]   ;;  %s715_s7 = inlined_call_operand.hbm [shape: f32[1,512], index: 7, kind: output, shape index: {}]  }
   0x1   :  { %v12_v0 = vstv %s714_s6 }
   0x2   :  { %13 = vst [vmem:[#allocation2] sm:$0x1] %v12_v0 }
   0x3   :  { %v36_v1 = vld [vmem:[%s709_s1 + $0x10] sm:$0xff]  ;;  %v34_v2 = vld [vmem:[%s709_s1] sm:$0xff]  ;;  %v494_v3 = vmov 0   ;;  %v35_v4 = vld [vmem:[%s709_s1 + $0x8] sm:$0xff] }
   0x4   :  { %461 = vset.pattern.permute.xlu1 %v494_v3  ;;  %460 = vset.pattern.permute.xlu0 %v494_v3  ;;  %v30_v5 = vld [vmem:[%s710_s2] sm:$0xff] }
   0x5   :  { %50 = vperm.xlu1 %461, %v36_v1   ;;  %40 = vperm.xlu0 %460, %v34_v2  }
   0x6   :  { %14 = vsyncpa [#allocation4], 0  ;;  %v31_v6 = vld [vmem:[%s710_s2 + $0x8] sm:$0xff]  ;;  %v37_v7 = vld [vmem:[%s709_s1 + $0x18] sm:$0xff]  ;;  %v59_v10 = vlaneseq }
   0x7   :  { %v32_v8 = vld [vmem:[%s710_s2 + $0x10] sm:$0xff]  ;;  %v33_v9 = vld [vmem:[%s710_s2 + $0x18] sm:$0xff]  ;;  %v29_v14 = vld [vmem:[%s708_s0] sm:$0xf] }
   0x8   :  { %v565_v11 = vshrl.u32 %v59_v10, 7  ;;  %vm440_vm0 = vcmp.lt.s32.totalorder %v59_v10, 512 }
   0x9   :  { %45 = vperm.xlu0 %460, %v35_v4   ;;  %97 = vperm.xlu1 %461, %v30_v5  }
   0xa   :  { %v61_v12 = vsub.s32 0, %v565_v11  ;;  %v65_v13 = vsub.s32 1, %v565_v11  ;;  %v69_v15 = vsub.s32 2, %v565_v11  ;;  %v73_v20 = vsub.s32 3, %v565_v11 }
   0xc   :  { %v62_v16 = vrot.slane %v29_v14, %v61_v12  ;;  %v66_v18 = vrot.slane %v29_v14, %v65_v13  ;;  %v70_v21 = vrot.slane %v29_v14, %v69_v15  ;;  %v74_v26 = vrot.slane %v29_v14, %v73_v20 }
   0xd   :  { %102 = vperm.xlu0 %460, %v31_v6   ;;  %55 = vperm.xlu1 %461, %v37_v7  }
  0x11   :  { %107 = vperm.xlu0 %460, %v32_v8   ;;  %112 = vperm.xlu1 %461, %v33_v9  }
  0x84   :  { %v51_v17 = vpop.permute.xlu1 %50  ;;  %v41_v19 = vpop.permute.xlu0 %40 }
  0x85   :  { %v79_v22 = vmul.f32 %v62_v16, %v41_v19  ;;  %v80_v23 = vmul.f32 %v66_v18, %v41_v19  ;;  %v81_v28 = vmul.f32 %v70_v21, %v41_v19  ;;  %v82_v34 = vmul.f32 %v74_v26, %v41_v19 }
  0x86   :  { %v87_v39 = vmul.f32 %v62_v16, %v51_v17  ;;  %v88_v43 = vmul.f32 %v66_v18, %v51_v17  ;;  %v89_v47 = vmul.f32 %v70_v21, %v51_v17  ;;  %v90_v59 = vmul.f32 %v74_v26, %v51_v17 }
  0x88   :  { %v46_v24 = vpop.permute.xlu0 %45  ;;  %v98_v25 = vpop.permute.xlu1 %97 }
  0x89   :  { %v115_v27 = vadd.f32 %v98_v25, %v79_v22  ;;  %v116_v29 = vadd.f32 %v98_v25, %v80_v23  ;;  %v83_v30 = vmul.f32 %v62_v16, %v46_v24  ;;  %v84_v31 = vmul.f32 %v66_v18, %v46_v24 }
  0x8a   :  { %v117_v35 = vadd.f32 %v98_v25, %v81_v28  ;;  %v85_v40 = vmul.f32 %v70_v21, %v46_v24  ;;  %v118_v41 = vadd.f32 %v98_v25, %v82_v34  ;;  %v86_v51 = vmul.f32 %v74_v26, %v46_v24 }
  0x8b   :  { %v131_v36 = vadd.f32 %v116_v29, %v115_v27 }
  0x8c   :  { %v103_v32 = vpop.permute.xlu0 %102  ;;  %v56_v33 = vpop.permute.xlu1 %55 }
  0x8d   :  { %v119_v37 = vadd.f32 %v103_v32, %v83_v30  ;;  %v120_v38 = vadd.f32 %v103_v32, %v84_v31  ;;  %v132_v42 = vadd.f32 %v131_v36, %v117_v35  ;;  %v91_v44 = vmul.f32 %v62_v16, %v56_v33 }
  0x8e   :  { %v92_v45 = vmul.f32 %v66_v18, %v56_v33  ;;  %v121_v52 = vadd.f32 %v103_v32, %v85_v40  ;;  %v122_v57 = vadd.f32 %v103_v32, %v86_v51  ;;  %v93_v60 = vmul.f32 %v70_v21, %v56_v33 }
  0x8f   :  { %v136_v46 = vadd.f32 %v120_v38, %v119_v37  ;;  %v133_v50 = vadd.f32 %v132_v42, %v118_v41  ;;  %v94_v5 = vmul.f32 %v74_v26, %v56_v33 }
  0x90   :  { %v108_v48 = vpop.permute.xlu0 %107  ;;  %v113_v49 = vpop.permute.xlu1 %112 }
  0x91   :  { %v123_v53 = vadd.f32 %v108_v48, %v87_v39  ;;  %v124_v54 = vadd.f32 %v108_v48, %v88_v43  ;;  %v127_v55 = vadd.f32 %v113_v49, %v91_v44  ;;  %v128_v56 = vadd.f32 %v113_v49, %v92_v45  ;;  %134 = vadd.xlane.f32.xlu0 %v133_v50 }
  0x92   :  { %v137_v58 = vadd.f32 %v136_v46, %v121_v52  ;;  %v125_v61 = vadd.f32 %v108_v48, %v89_v47  ;;  %v126_v1 = vadd.f32 %v108_v48, %v90_v59  ;;  %v129_v3 = vadd.f32 %v113_v49, %v93_v60 }
  0x93   :  { %v141_v62 = vadd.f32 %v124_v54, %v123_v53  ;;  %v146_v63 = vadd.f32 %v128_v56, %v127_v55  ;;  %v130_v7 = vadd.f32 %v113_v49, %v94_v5 }
  0x94   :  { %v138_v0 = vadd.f32 %v137_v58, %v122_v57 }
  0x95   :  { %v142_v2 = vadd.f32 %v141_v62, %v125_v61  ;;  %v147_v6 = vadd.f32 %v146_v63, %v129_v3 }
  0x96   :  { %139 = vadd.xlane.f32.xlu1 %v138_v0  ;;  %v263_v0 = vld [vmem:[%s712_s4] sm:$0xff] }
  0x97   :  { %v143_v4 = vadd.f32 %v142_v2, %v126_v1  ;;  %v148_v8 = vadd.f32 %v147_v6, %v130_v7  ;;  %v264_v2 = vld [vmem:[%s712_s4 + $0x8] sm:$0xff] }
  0x99   :  { %144 = vadd.xlane.f32.xlu0 %v143_v4 }
  0x9d   :  { %149 = vadd.xlane.f32.xlu0 %v148_v8 }
 0x11e   :  { %v135_v9 = vpop.xlane.xlu0 %134 }
 0x11f   :  { %v151_v13 = vmul.f32 0.001953125, %v135_v9 }
 0x121   :  { %v576_v14 = vsub.f32 %v115_v27, %v151_v13  ;;  %v578_v15 = vsub.f32 %v116_v29, %v151_v13  ;;  %v580_v16 = vsub.f32 %v117_v35, %v151_v13  ;;  %v582_v18 = vsub.f32 %v118_v41, %v151_v13 }
 0x123   :  { %v140_v17 = vpop.xlane.xlu1 %139  ;;  %v171_v20 = vmul.f32 %v576_v14, %v576_v14  ;;  %v172_v21 = vmul.f32 %v578_v15, %v578_v15  ;;  %v173_v22 = vmul.f32 %v580_v16, %v580_v16  ;;  %v174_v29 = vmul.f32 %v582_v18, %v582_v18 }
 0x124   :  { %v152_v19 = vmul.f32 0.001953125, %v140_v17 }
 0x125   :  { %v187_v26 = vadd.f32 %v172_v21, %v171_v20 }
 0x126   :  { %v590_v23 = vsub.f32 %v119_v37, %v152_v19  ;;  %v592_v24 = vsub.f32 %v120_v38, %v152_v19  ;;  %v145_v25 = vpop.xlane.xlu0 %144  ;;  %v594_v27 = vsub.f32 %v121_v52, %v152_v19  ;;  %v598_v31 = vsub.f32 %v122_v57, %v152_v19 }
 0x127   :  { %v153_v28 = vmul.f32 0.001953125, %v145_v25  ;;  %v188_v30 = vadd.f32 %v187_v26, %v173_v22  ;;  %v211_v22 = vld [vmem:[%s711_s3] sm:$0xff] }
 0x128   :  { %v175_v32 = vmul.f32 %v590_v23, %v590_v23  ;;  %v176_v33 = vmul.f32 %v592_v24, %v592_v24  ;;  %v177_v39 = vmul.f32 %v594_v27, %v594_v27  ;;  %v178_v45 = vmul.f32 %v598_v31, %v598_v31 }
 0x129   :  { %v604_v34 = vsub.f32 %v123_v53, %v153_v28  ;;  %v606_v35 = vsub.f32 %v124_v54, %v153_v28  ;;  %v608_v36 = vsub.f32 %v125_v61, %v153_v28  ;;  %v189_v38 = vadd.f32 %v188_v30, %v174_v29  ;;  %v212_v29 = vld [vmem:[%s711_s3 + $0x8] sm:$0xff] }
 0x12a   :  { %v150_v37 = vpop.xlane.xlu0 %149  ;;  %v192_v40 = vadd.f32 %v176_v33, %v175_v32  ;;  %v612_v41 = vsub.f32 %v126_v1, %v153_v28  ;;  %v266_v1 = vld [vmem:[%s712_s4 + $0x18] sm:$0xff]  ;;  %v213_v33 = vld [vmem:[%s711_s3 + $0x10] sm:$0xff] }
 0x12b   :  { %v154_v42 = vmul.f32 0.001953125, %v150_v37  ;;  %v179_v43 = vmul.f32 %v604_v34, %v604_v34  ;;  %v180_v44 = vmul.f32 %v606_v35, %v606_v35  ;;  %190 = vadd.xlane.f32.xlu1 %v189_v38  ;;  %v181_v47 = vmul.f32 %v608_v36, %v608_v36 }
 0x12c   :  { %v193_v46 = vadd.f32 %v192_v40, %v177_v39  ;;  %v182_v53 = vmul.f32 %v612_v41, %v612_v41  ;;  %v320_v39 = vld [vmem:[%s713_s5] sm:$0xff]  ;;  %v214_v40 = vld [vmem:[%s711_s3 + $0x18] sm:$0xff]  ;;  %s496_s3 = smov [#allocation3]  }
 0x12d   :  { %v622_v48 = vsub.f32 %v127_v55, %v154_v42  ;;  %v624_v49 = vsub.f32 %v128_v56, %v154_v42  ;;  %v197_v50 = vadd.f32 %v180_v44, %v179_v43  ;;  %v626_v51 = vsub.f32 %v129_v3, %v154_v42  ;;  %v265_v3 = vld [vmem:[%s712_s4 + $0x10] sm:$0xff] }
 0x12e   :  { %v194_v52 = vadd.f32 %v193_v46, %v178_v45  ;;  %v630_v57 = vsub.f32 %v130_v7, %v154_v42  ;;  %v322_v43 = vld [vmem:[%s713_s5 + $0x10] sm:$0xff]  ;;  %v321_v45 = vld [vmem:[%s713_s5 + $0x8] sm:$0xff]  ;;  %v319_v46 = vld [vmem:[#allocation2] sm:$0x1] }
 0x12f   :  { %v198_v54 = vadd.f32 %v197_v50, %v181_v47  ;;  %v183_v58 = vmul.f32 %v622_v48, %v622_v48  ;;  %v184_v59 = vmul.f32 %v624_v49, %v624_v49  ;;  %v185_v56 = vmul.f32 %v626_v51, %v626_v51  ;;  %v323_v47 = vld [vmem:[%s713_s5 + $0x18] sm:$0xff]  ;;  %s449_s5 = sshll.u32 %s496_s3, 4  ;;  %s450_s5 = int_to_ptr.vmem [resolvable:$true] %s449_s5 }
 0x130   :  { %195 = vadd.xlane.f32.xlu0 %v194_v52  ;;  %v186_v61 = vmul.f32 %v630_v57, %v630_v57  ;;  %s470_s16 = scalar_lea.vmem %s450_s5, 64  ;;  %p475_p1 = scmp.lt.s32.totalorder %s450_s5, %s450_s5 }
 0x131   :  { %v199_v55 = vadd.f32 %v198_v54, %v182_v53  ;;  %v202_v60 = vadd.f32 %v184_v59, %v183_v58  ;;  %p471_p0 = scmp.ne.s32.totalorder %s450_s5, %s470_s16  ;;  %p476_p2 = scmp.lt.s32.totalorder %s470_s16, %s470_s16 }
 0x133   :  { %200 = vadd.xlane.f32.xlu1 %v199_v55  ;;  %v203_v62 = vadd.f32 %v202_v60, %v185_v56  ;;  %p477_p3 = por %p476_p2, %p475_p1 }
 0x135   :  { %v204_v63 = vadd.f32 %v203_v62, %v186_v61  ;;  %p478_p4 = pnand %p477_p3, %p471_p0 }
 0x137   :  { %205 = vadd.xlane.f32.xlu0 %v204_v63 }
 0x144   :  { %269 = vperm.xlu1 %461, %v263_v0  }
 0x148   :  { %284 = vperm.xlu1 %461, %v266_v1  }
 0x14d   :  { %274 = vperm.xlu0 %460, %v264_v2  }
 0x151   :  { %279 = vperm.xlu0 %460, %v265_v3  }
 0x1b8   :  { %v191_v4 = vpop.xlane.xlu1 %190 }
 0x1b9   :  { %v207_v5 = vmul.f32 0.001953125, %v191_v4 }
 0x1bb   :  { %v215_v6 = vadd.f32 1e-05, %v207_v5 }
 0x1bd   :  { %v196_v7 = vpop.xlane.xlu0 %195  ;;  %462 = vrsqrt.f32 %v215_v6 }
 0x1be   :  { %v208_v8 = vmul.f32 0.001953125, %v196_v7 }
 0x1c0   :  { %v216_v9 = vadd.f32 1e-05, %v208_v8  ;;  %v201_v13 = vpop.xlane.xlu1 %200 }
 0x1c1   :  { %v209_v17 = vmul.f32 0.001953125, %v201_v13 }
 0x1c2   :  { %464 = vrsqrt.f32 %v216_v9 }
 0x1c3   :  { %v217_v19 = vadd.f32 1e-05, %v209_v17 }
 0x1c4   :  { %v206_v20 = vpop.xlane.xlu0 %205  ;;  %v270_v50 = vpop.permute.xlu1 %269 }
 0x1c5   :  { %466 = vrsqrt.f32 %v217_v19  ;;  %v210_v21 = vmul.f32 0.001953125, %v206_v20 }
 0x1c7   :  { %v218_v25 = vadd.f32 1e-05, %v210_v21  ;;  %v463_v26 = vpop.eup %462 }
 0x1c8   :  { %v223_v28 = vmul.f32 %v463_v26, %v211_v22  ;;  %v285_v53 = vpop.permute.xlu1 %284 }
 0x1c9   :  { %468 = vrsqrt.f32 %v218_v25 }
 0x1ca   :  { %229 = vperm.xlu1 %461, %v223_v28  }
 0x1cc   :  { %v465_v30 = vpop.eup %464  ;;  %v275_v52 = vpop.permute.xlu0 %274 }
 0x1cd   :  { %v224_v32 = vmul.f32 %v465_v30, %v212_v29 }
 0x1cf   :  { %v467_v37 = vpop.eup %466  ;;  %234 = vperm.xlu0 %460, %v224_v32  }
 0x1d0   :  { %v225_v38 = vmul.f32 %v467_v37, %v213_v33  ;;  %v280_v54 = vpop.permute.xlu0 %279 }
 0x1d2   :  { %239 = vperm.xlu1 %461, %v225_v38  }
 0x1d3   :  { %v469_v42 = vpop.eup %468  ;;  %326 = vperm.xlu0 %460, %v320_v39  }
 0x1d4   :  { %v226_v44 = vmul.f32 %v469_v42, %v214_v40 }
 0x1d6   :  { %244 = vperm.xlu1 %461, %v226_v44  }
 0x1d7   :  { %336 = vperm.xlu0 %460, %v322_v43  }
 0x1da   :  { %331 = vperm.xlu1 %461, %v321_v45  }
 0x1db   :  { %398 = vperm.xlu0 %460, %v319_v46  }
 0x1de   :  { %341 = vperm.xlu1 %461, %v323_v47  }
 0x249   :  { %v230_v58 = vpop.permute.xlu1 %229 }
 0x24a   :  { %v247_v59 = vmul.f32 %v230_v58, %v576_v14  ;;  %v248_v55 = vmul.f32 %v230_v58, %v578_v15  ;;  %v249_v56 = vmul.f32 %v230_v58, %v580_v16  ;;  %v250_v60 = vmul.f32 %v230_v58, %v582_v18 }
 0x24c   :  { %v287_v61 = vadd.f32 %v270_v50, %v247_v59  ;;  %v288_v62 = vadd.f32 %v270_v50, %v248_v55  ;;  %v289_v63 = vadd.f32 %v270_v50, %v249_v56  ;;  %v290_v0 = vadd.f32 %v270_v50, %v250_v60 }
 0x24e   :  { %v235_v1 = vpop.permute.xlu0 %234  ;;  %v303_v6 = vmax.f32 %v287_v61, 0.0  ;;  %v304_v15 = vmax.f32 %v288_v62, 0.0  ;;  %v305_v7 = vmax.f32 %v289_v63, 0.0  ;;  %v306_v16 = vmax.f32 %v290_v0, 0.0 }
 0x24f   :  { %v251_v2 = vmul.f32 %v235_v1, %v590_v23  ;;  %v252_v3 = vmul.f32 %v235_v1, %v592_v24  ;;  %v253_v4 = vmul.f32 %v235_v1, %v594_v27  ;;  %v254_v5 = vmul.f32 %v235_v1, %v598_v31 }
 0x251   :  { %v240_v14 = vpop.permute.xlu1 %239  ;;  %v291_v17 = vadd.f32 %v275_v52, %v251_v2  ;;  %v292_v24 = vadd.f32 %v275_v52, %v252_v3  ;;  %v293_v19 = vadd.f32 %v275_v52, %v253_v4  ;;  %v294_v27 = vadd.f32 %v275_v52, %v254_v5 }
 0x252   :  { %v255_v18 = vmul.f32 %v240_v14, %v604_v34  ;;  %v256_v8 = vmul.f32 %v240_v14, %v606_v35  ;;  %v257_v9 = vmul.f32 %v240_v14, %v608_v36  ;;  %v258_v13 = vmul.f32 %v240_v14, %v612_v41  ;;  %v327_v23 = vpop.permute.xlu0 %326 }
 0x253   :  { %v344_v31 = vmul.f32 %v327_v23, %v303_v6  ;;  %v345_v21 = vmul.f32 %v327_v23, %v304_v15  ;;  %v346_v22 = vmul.f32 %v327_v23, %v305_v7  ;;  %v347_v29 = vmul.f32 %v327_v23, %v306_v16 }
 0x254   :  { %v295_v20 = vadd.f32 %v280_v54, %v255_v18  ;;  %v296_v25 = vadd.f32 %v280_v54, %v256_v8  ;;  %v297_v26 = vadd.f32 %v280_v54, %v257_v9  ;;  %v298_v28 = vadd.f32 %v280_v54, %v258_v13 }
 0x255   :  { %v245_v34 = vpop.permute.xlu1 %244  ;;  %v307_v33 = vmax.f32 %v291_v17, 0.0  ;;  %v308_v37 = vmax.f32 %v292_v24, 0.0  ;;  %v309_v38 = vmax.f32 %v293_v19, 0.0  ;;  %v310_v39 = vmax.f32 %v294_v27, 0.0 }
 0x256   :  { %v259_v35 = vmul.f32 %v245_v34, %v622_v48  ;;  %v260_v36 = vmul.f32 %v245_v34, %v624_v49  ;;  %v261_v41 = vmul.f32 %v245_v34, %v626_v51  ;;  %v262_v30 = vmul.f32 %v245_v34, %v630_v57  ;;  %v337_v48 = vpop.permute.xlu0 %336 }
 0x257   :  { %v311_v32 = vmax.f32 %v295_v20, 0.0  ;;  %v312_v44 = vmax.f32 %v296_v25, 0.0  ;;  %v313_v45 = vmax.f32 %v297_v26, 0.0  ;;  %v314_v46 = vmax.f32 %v298_v28, 0.0 }
 0x258   :  { %v299_v40 = vadd.f32 %v285_v53, %v259_v35  ;;  %v300_v42 = vadd.f32 %v285_v53, %v260_v36  ;;  %v301_v43 = vadd.f32 %v285_v53, %v261_v41  ;;  %v302_v50 = vadd.f32 %v285_v53, %v262_v30 }
 0x259   :  { %v332_v47 = vpop.permute.xlu1 %331  ;;  %v352_v58 = vmul.f32 %v337_v48, %v311_v32  ;;  %v353_v63 = vmul.f32 %v337_v48, %v312_v44  ;;  %v354_v0 = vmul.f32 %v337_v48, %v313_v45  ;;  %v355_v1 = vmul.f32 %v337_v48, %v314_v46 }
 0x25a   :  { %v348_v52 = vmul.f32 %v332_v47, %v307_v33  ;;  %v349_v49 = vmul.f32 %v332_v47, %v308_v37  ;;  %v350_v54 = vmul.f32 %v332_v47, %v309_v38  ;;  %v351_v51 = vmul.f32 %v332_v47, %v310_v39  ;;  %v399_v36 = vpop.permute.xlu0 %398 }
 0x25b   :  { %v315_v57 = vmax.f32 %v299_v40, 0.0  ;;  %v316_v59 = vmax.f32 %v300_v42, 0.0  ;;  %v317_v55 = vmax.f32 %v301_v43, 0.0  ;;  %v318_v2 = vmax.f32 %v302_v50, 0.0 }
 0x25c   :  { %v360_v56 = vadd.f32 %v348_v52, %v344_v31  ;;  %v369_v60 = vadd.f32 %v349_v49, %v345_v21  ;;  %v378_v61 = vadd.f32 %v350_v54, %v346_v22  ;;  %v387_v62 = vadd.f32 %v351_v51, %v347_v29 }
 0x25d   :  { %v342_v3 = vpop.permute.xlu1 %341  ;;  %v495_v29 = vmov 1966171168   ;;  %v404_v42 = vrot.slane %v399_v36, %v61_v12 }
 0x25e   :  { %v356_v4 = vmul.f32 %v342_v3, %v315_v57  ;;  %v357_v53 = vmul.f32 %v342_v3, %v316_v59  ;;  %v358_v5 = vmul.f32 %v342_v3, %v317_v55  ;;  %v361_v14 = vadd.f32 %v360_v56, %v352_v58 }
 0x25f   :  { %v359_v6 = vmul.f32 %v342_v3, %v318_v2  ;;  %v370_v15 = vadd.f32 %v369_v60, %v353_v63  ;;  %v379_v7 = vadd.f32 %v378_v61, %v354_v0  ;;  %v388_v16 = vadd.f32 %v387_v62, %v355_v1 }
 0x260   :  { %v362_v18 = vadd.f32 %v361_v14, %v356_v4  ;;  %v416_v34 = vunpack.c.l.s4 %v495_v29 }
 0x261   :  { %v371_v8 = vadd.f32 %v370_v15, %v357_v53  ;;  %v380_v9 = vadd.f32 %v379_v7, %v358_v5  ;;  %v389_v13 = vadd.f32 %v388_v16, %v359_v6 }
 0x262   :  { %v363_v23 = vrot.slane %v362_v18, 4  ;;  %v417_v40 = vunpack.c.0.s8 %v416_v34 }
 0x263   :  { %v372_v17 = vrot.slane %v371_v8, 4  ;;  %v381_v24 = vrot.slane %v380_v9, 4  ;;  %v390_v19 = vrot.slane %v389_v13, 4 }
 0x264   :  { %v364_v27 = vadd.f32 %v363_v23, %v362_v18  ;;  %v420_v49 = vsub.s32 %v417_v40, %v565_v11 }
 0x265   :  { %v373_v20 = vadd.f32 %v372_v17, %v371_v8  ;;  %v382_v31 = vadd.f32 %v381_v24, %v380_v9  ;;  %v391_v21 = vadd.f32 %v390_v19, %v389_v13 }
 0x266   :  { %v365_v22 = vrot.slane %v364_v27, 2 }
 0x267   :  { %v374_v25 = vrot.slane %v373_v20, 2  ;;  %v383_v26 = vrot.slane %v382_v31, 2  ;;  %v392_v28 = vrot.slane %v391_v21, 2 }
 0x268   :  { %v366_v35 = vadd.f32 %v365_v22, %v364_v27 }
 0x269   :  { %v375_v41 = vadd.f32 %v374_v25, %v373_v20  ;;  %v384_v30 = vadd.f32 %v383_v26, %v382_v31  ;;  %v393_v32 = vadd.f32 %v392_v28, %v391_v21 }
 0x26a   :  { %v367_v33 = vrot.slane %v366_v35, 1 }
 0x26b   :  { %v376_v37 = vrot.slane %v375_v41, 1  ;;  %v385_v38 = vrot.slane %v384_v30, 1  ;;  %v394_v39 = vrot.slane %v393_v32, 1 }
 0x26c   :  { %v368_v43 = vadd.f32 %v367_v33, %v366_v35 }
 0x26d   :  { %v377_v44 = vadd.f32 %v376_v37, %v375_v41  ;;  %v386_v45 = vadd.f32 %v385_v38, %v384_v30  ;;  %v395_v46 = vadd.f32 %v394_v39, %v393_v32 }
 0x26e   :  { %v405_v47 = vadd.f32 %v404_v42, %v368_v43 }
 0x26f   :  { %v406_v50 = vadd.f32 %v404_v42, %v377_v44  ;;  %v407_v48 = vadd.f32 %v404_v42, %v386_v45  ;;  %v408_v52 = vadd.f32 %v404_v42, %v395_v46 }
 0x271   :  { %v413_v54 = vcombine.low %v405_v47, %v406_v50  ;;  %v414_v51 = vcombine.low %v407_v48, %v408_v52 }
 0x273   :  { %v421_v58 = vrot.slane %v413_v54, %v420_v49  ;;  %v428_v57 = vrot.slane %v414_v51, %v420_v49 }
 0x275   :  { %v429_v59 = vcombine.low %v421_v58, %v428_v57 }
 0x277   :  { %v436_v12 = vrot.slane %v429_v59, %v420_v49 }
 0x279   :  { %442 = vst.msk [vmem:[#allocation3] sm:$0xf] %vm440_vm0, %v436_v12 }
 0x27a   :  { %481 = shalt.err (!%p478_p4)
}
 0x27b   :  { %s482_s18 = scalar_lea.hbm %s715_s7, 64 }
 0x27c   :  { %p483_p5 = scmp.ne.s32.totalorder %s715_s7, %s482_s18  ;;  %p486_p6 = scmp.lt.u32.totalorder %s482_s18, %s715_s7 }
 0x27e   :  { %p488_p7 = pnand %p486_p6, %p483_p5 }
 0x280   :  { %491 = shalt.err (!%p488_p7)
}
 0x281   :  { %452 = dma.vmem_to_hbm [thread:$0]  %s450_s5, 64, %s715_s7, [#allocation4]  }
 0x282   :  { %492 = dma.done.wait [#allocation4], 64  }
 0x283   :  { %493 = vsyncadd [#allocation4], 4294967232 }
 0x284   :  { %456 = vsyncpa [#allocation4], 1 }

</bundles_post_ra>
